<compile_context>
chip_gen: v7x
topology: tpu7x:2x2x1
jax: 0.10.0
libtpu: 0.0.40
codegen_flags: <defaults>
</compile_context>

<pallas_src>
import functools
import math

import jax
import jax.numpy as jnp
from jax.experimental import pallas as pl
from jax.experimental.pallas import tpu as pltpu


# Double-buffered working-set budget: conservative vs v5e's 16 MiB scoped-VMEM
# default and far under v7x's 64 MiB physical VMEM.
_VMEM_BUDGET_BYTES = 10 * 1024 * 1024
# Below this batch size the kernel is launch-overhead bound; use one block
# (splitting for v7x's second TC would only add per-step overhead).
_SINGLE_BLOCK_MAX = 256


def _make_kernel(half_dim: int, dim: int, inkernel_freq: bool, scale: float):
    """Builds the kernel body.

    split (half_dim % 128 == 0): half-width args, sin once + cos once, two
      contiguous lane-aligned stores.
    non-split: full-width select form (bit-exact vs cat(sin, cos)).
    inkernel_freq: compute the freq row with iota+exp inside the kernel
      (single-block / launch-bound path) instead of taking it as an input.
    """
    split = (half_dim % 128 == 0)
    fdim = half_dim if split else dim

    def kernel(*refs):
        if inkernel_freq:
            time_ref, out_ref = refs
            k = jax.lax.broadcasted_iota(jnp.int32, (1, fdim), 1)
            if not split:
                # Repeat freq over both halves: k mod half_dim (exact in int32).
                k = jnp.where(k >= half_dim, k - half_dim, k)
            freq = jnp.exp(k.astype(jnp.float32) * (-scale))      # (1, fdim)
        else:
            time_ref, freq_ref, out_ref = refs
            freq = freq_ref[...]                                   # (1, fdim)

        t = time_ref[...]                                          # (TB, 1) f32
        args = t * freq                                            # (TB, fdim)

        if split:
            # Half the transcendental work: one sin + one cos on (TB, half).
            out_ref[:, :half_dim] = jnp.sin(args).astype(out_ref.dtype)
            out_ref[:, half_dim:] = jnp.cos(args).astype(out_ref.dtype)
        else:
            lane = jax.lax.broadcasted_iota(jnp.int32, args.shape, 1)
            result = jnp.where(lane < half_dim, jnp.sin(args), jnp.cos(args))
            out_ref[...] = result.astype(out_ref.dtype)

    return kernel


def _choose_tb(b: int, block_b: int, dim: int, out_itemsize: int, min_rows: int) -> int:
    """Pick the batch-tile size: VMEM-capped, >=2 balanced blocks for large B."""
    # Per-row double-buffered VMEM bytes: output tile + lane-padded (tb,1)->(tb,128)
    # f32 time block.  (The (1, fdim) freq row is sublane-padded but tiny.)
    per_row = 2 * dim * out_itemsize + 2 * 128 * 4
    vmem_cap = max(min_rows, ((_VMEM_BUDGET_BYTES // per_row) // min_rows) * min_rows)
    block_b = max(min_rows, (block_b // min_rows) * min_rows)
    cap = min(vmem_cap, block_b)

    if b <= min(_SINGLE_BLOCK_MAX, cap):
        return b  # single full-array block (full-dims exception; launch-bound regime)

    # >= 2 blocks so both v7x TensorCores get work; even count for balance.
    n_blocks = max(2, pl.cdiv(b, cap))
    if n_blocks % 2:
        n_blocks += 1
    tb = pl.cdiv(b, n_blocks)
    tb = ((tb + min_rows - 1) // min_rows) * min_rows
    return min(tb, cap)


def sinusoidal_position_embeddings(
    time: jax.Array,
    dim: int,
    *,
    block_b: int = 2048,
    out_dtype=jnp.float32,
) -> jax.Array:
    """Pallas equivalent of SinusoidalPositionEmbeddings(dim)(time).

    Args:
      time: float array of shape (B,)
      dim:  embedding dimension (must be even and >= 4)
      out_dtype: output dtype.  Compute is always f32; jnp.bfloat16 is the
        recommended output when the consumer accepts it (halves HBM writeback).
    Returns:
      array of shape (B, dim), dtype `out_dtype`.
    """
    assert dim % 2 == 0, "dim must be even"
    half_dim = dim // 2
    assert half_dim >= 2, "dim must be >= 4 (half_dim - 1 appears in the scale)"

    b = time.shape[0]
    time_f32 = time.astype(jnp.float32).reshape(b, 1)
    scale = math.log(10000.0) / (half_dim - 1)

    out_itemsize = jnp.dtype(out_dtype).itemsize
    min_rows = 16 if out_itemsize < 4 else 8   # bf16 sublane packing guard
    tb = _choose_tb(b, block_b, dim, out_itemsize, min_rows)
    grid = (pl.cdiv(b, tb),)
    single_block = grid[0] == 1

    split = (half_dim % 128 == 0)
    fdim = half_dim if split else dim

    kernel = _make_kernel(half_dim, dim, inkernel_freq=single_block, scale=scale)

    in_specs = [pl.BlockSpec((tb, 1), lambda i: (i, 0))]   # time tile
    call_args = [time_f32]
    if not single_block:
        # Hoisted, grid-invariant freq row (resident across all grid steps).
        k = jnp.arange(fdim, dtype=jnp.float32)
        if not split:
            k = k % half_dim
        freq = jnp.exp(-scale * k).reshape(1, fdim)
        in_specs.append(pl.BlockSpec((1, fdim), lambda i: (0, 0)))
        call_args.append(freq)

    # NOTE: no batch padding / post-call slice -- Pallas masks the ragged final
    # block of the (b, dim) output when tb does not divide b.
    return pl.pallas_call(
        kernel,
        out_shape=jax.ShapeDtypeStruct((b, dim), out_dtype),
        grid_spec=pltpu.PrefetchScalarGridSpec(
            num_scalar_prefetch=0,
            grid=grid,
            in_specs=in_specs,
            out_specs=pl.BlockSpec((tb, dim), lambda i: (i, 0)),
        ),
        compiler_params=pltpu.CompilerParams(
            # Batch axis is embarrassingly parallel -> shards across the two
            # TensorCores on v7x; harmless on single-TC v5e/v6e.
            dimension_semantics=("parallel",),
        ),
    )(*call_args)


def _reference(time: jax.Array, dim: int) -> jax.Array:
    half_dim = dim // 2
    emb = math.log(10000.0) / (half_dim - 1)
    emb = jnp.exp(jnp.arange(half_dim, dtype=jnp.float32) * -emb)
    emb = time.astype(jnp.float32)[:, None] * emb[None, :]
    return jnp.concatenate([jnp.sin(emb), jnp.cos(emb)], axis=-1)


if __name__ == "__main__":
    root = jax.random.PRNGKey(0)
    keys = jax.random.split(root, 4)

    def _check(key, b, dim, out_dtype, atol, label):
        t = jax.random.uniform(key, (b,), dtype=jnp.float32, minval=0.0, maxval=1000.0)
        out = jax.block_until_ready(
            sinusoidal_position_embeddings(t, dim, out_dtype=out_dtype)
        )
        ref = _reference(t, dim)
        assert out.shape == (b, dim), f"{label}: bad shape {out.shape}"
        assert out.dtype == jnp.dtype(out_dtype), f"{label}: bad dtype {out.dtype}"
        assert jnp.allclose(out.astype(jnp.float32), ref, atol=atol, rtol=1e-5), (
            f"{label}: mismatch vs reference"
        )

    # 1) Small realistic diffusion case: dim=128 -> select kernel, single block,
    #    in-kernel freq (no second input stream).
    _check(keys[0], 8, 128, jnp.float32, 3e-5, "small B, dim=128")

    # 2) Single-block, lane-aligned half: dim=256 -> split kernel (sin once,
    #    cos once), in-kernel freq.
    _check(keys[1], 32, 256, jnp.float32, 3e-5, "small B, dim=256")

    # 3) Tiled path, dim=256, B not a tile multiple: balanced grid of 2 blocks
    #    (2 x 520), hoisted freq row, ragged-block masking (no pad, no slice).
    _check(keys[2], 1040, 256, jnp.float32, 3e-5, "tiled B, dim=256")

    # 4) Recommended bf16 output path (compute stays f32, cast at store).
    _check(keys[3], 1040, 128, jnp.bfloat16, 1e-2, "tiled B, bf16 out")

    print("KERNEL_OK")
</pallas_src>

<mosaic_0001>
module attributes {stable_mosaic.version = 11 : i64} {
  func.func @kernel(%arg0: i32, %arg1: memref<8x1xf32, #tpu.memory_space<vmem>>, %arg2: memref<8x128xf32, #tpu.memory_space<vmem>>) attributes {dimension_semantics = [#tpu.dimension_semantics<parallel>], iteration_bounds = array<i64: 1>, scalar_prefetch = 0 : i64, scratch_operands = 0 : i64, tpu.core_type = #tpu.core_type<tc>, window_params = [{transform_indices = @transform_0, window_bounds = array<i64: 8, 1>}, {transform_indices = @transform_1, window_bounds = array<i64: 8, 128>}]} {
    %0 = tpu.iota {dimensions = array<i32: 1>} : vector<1x128xi32>
    %c64_i32 = arith.constant 64 : i32
    %1 = vector.broadcast %c64_i32 : i32 to vector<1x128xi32>
    %2 = arith.cmpi sge, %0, %1 : vector<1x128xi32>
    %c64_i32_0 = arith.constant 64 : i32
    %3 = vector.broadcast %c64_i32_0 : i32 to vector<1x128xi32>
    %4 = arith.subi %0, %3 : vector<1x128xi32>
    %5 = arith.select %2, %4, %0 : vector<1x128xi1>, vector<1x128xi32>
    %6 = arith.sitofp %5 : vector<1x128xi32> to vector<1x128xf32>
    %cst = arith.constant -0.146195874 : f32
    %7 = vector.broadcast %cst : f32 to vector<1x128xf32>
    %8 = arith.mulf %6, %7 : vector<1x128xf32>
    %9 = math.exp %8 : vector<1x128xf32>
    %c0 = arith.constant 0 : index
    %c0_1 = arith.constant 0 : index
    %10 = vector.load %arg1[%c0, %c0_1] : memref<8x1xf32, #tpu.memory_space<vmem>>, vector<8x1xf32>
    %11 = vector.broadcast %10 : vector<8x1xf32> to vector<8x128xf32>
    %12 = vector.broadcast %9 : vector<1x128xf32> to vector<8x128xf32>
    %13 = arith.mulf %11, %12 : vector<8x128xf32>
    %14 = tpu.iota {dimensions = array<i32: 1>} : vector<8x128xi32>
    %c64_i32_2 = arith.constant 64 : i32
    %15 = vector.broadcast %c64_i32_2 : i32 to vector<8x128xi32>
    %16 = arith.cmpi slt, %14, %15 : vector<8x128xi32>
    %17 = math.sin %13 : vector<8x128xf32>
    %18 = math.cos %13 : vector<8x128xf32>
    %19 = arith.select %16, %17, %18 : vector<8x128xi1>, vector<8x128xf32>
    %c0_3 = arith.constant 0 : index
    %c0_4 = arith.constant 0 : index
    %20 = vector.load %arg2[%c0_3, %c0_4] : memref<8x128xf32, #tpu.memory_space<vmem>>, vector<8x128xf32>
    tpu.vector_store %arg2[%c0_3, %c0_4], %19 {strides = array<i32>} : memref<8x128xf32, #tpu.memory_space<vmem>>, vector<8x128xf32>,
    return
  }
  func.func @transform_0(%arg0: i32) -> (i32, i32) {
    %c0_i32 = arith.constant 0 : i32
    %c0_i32_0 = arith.constant 0 : i32
    return %arg0, %c0_i32 : i32, i32
  }
  func.func @transform_1(%arg0: i32) -> (i32, i32) {
    %c0_i32 = arith.constant 0 : i32
    %c0_i32_0 = arith.constant 0 : i32
    return %arg0, %c0_i32 : i32, i32
  }
}

</mosaic_0001>

<bundles_post_ra>
// kernel: tpu_custom_call.1
= control target key start
LH: loop header
LB: loop body
LE: loop exit
PB: predicated region body
PF: predicated region fallthrough
CT: control target
= control target key end

     0   :  { %v301_v1 = vmov 0   ;;  %s363_s0 = inlined_call_operand.vmem [shape: f32[8,1], index: 0, kind: input, shape index: {}]   ;;  %s364_s1 = inlined_call_operand.hbm [shape: f32[8,128], index: 1, kind: output, shape index: {}]  }
   0x1   :  { %v18_v0 = vld [vmem:[%s363_s0] sm:$0xff]  ;;  %270 = vset.pattern.permute.xlu0 %v301_v1 }
   0x2   :  { %21 = vperm.xlu0 %270, %v18_v0  }
   0x3   :  { %6 = vsyncpa [#allocation3], 0  ;;  %v9_v2 = vlaneseq  ;;  %v302_v22 = vmov 683565275   ;;  %v303_v24 = vmov 2475754826  }
   0x4   :  { %v304_v27 = vmov 2131351028   ;;  %v305_v30 = vmov 2102212464   ;;  %v306_v33 = vmov 920167782  }
   0x5   :  { %v322_v3 = vand.u32 127, %v9_v2  ;;  %v307_v36 = vmov 1326507024   ;;  %s308_s0 = smov [#allocation2]  }
   0x6   :  { %s241_s8 = sshll.u32 %s308_s0, 4  ;;  %s242_s8 = int_to_ptr.vmem [resolvable:$true] %s241_s8 }
   0x7   :  { %v249_v4 = vadd.s32 4294967232, %v322_v3  ;;  %vm11_vm0 = vcmp.ge.s32.totalorder %v322_v3, 64  ;;  %vm25_vm10 = vcmp.lt.s32.totalorder %v322_v3, 64  ;;  %s277_s9 = scalar_lea.vmem %s242_s8, 128  ;;  %p282_p1 = scmp.lt.s32.totalorder %s242_s8, %s242_s8 }
   0x8   :  { %p278_p0 = scmp.ne.s32.totalorder %s242_s8, %s277_s9  ;;  %p283_p2 = scmp.lt.s32.totalorder %s277_s9, %s277_s9 }
   0x9   :  { %v13_v5 = vsel %vm11_vm0, %v249_v4, %v322_v3 }
   0xa   :  { %v14_v6 = vcvt.s32.f32 %v13_v5  ;;  %p284_p3 = por %p283_p2, %p282_p1 }
   0xc   :  { %v15_v7 = vmul.f32 -0.14619587, %v14_v6  ;;  %p285_p4 = pnand %p284_p3, %p278_p0 }
   0xe   :  { %v16_v8 = vmul.f32 1.442695, %v15_v7 }
  0x10   :  { %271 = vpow2.f32 %v16_v8 }
  0x1a   :  { %v272_v9 = vpop.eup %271 }
  0x81   :  { %v22_v10 = vpop.permute.xlu0 %21 }
  0x82   :  { %v327_v11 = vmul.f32 %v272_v9, %v22_v10 }
  0x84   :  { %v29_v12 = vand.u32 2139095040, %v327_v11  ;;  %v26_v16 = vand.u32 2147483647, %v327_v11  ;;  %vm28_vm8 = vcmp.lt.s32.totalorder %v327_v11, 0 }
  0x86   :  { %v30_v13 = vshrl.u32 %v29_v12, 23  ;;  %v33_v19 = vand.u32 8388607, %v26_v16  ;;  %vm27_vm9 = vcmp.le.f32.partialorder %v26_v16, 0.7853982 }
  0x88   :  { %v250_v14 = vadd.s32 4294967169, %v30_v13  ;;  %v34_v38 = vor.u32 8388608, %v33_v19 }
  0x8a   :  { %v36_v15 = vadd.s32 1, %v250_v14  ;;  %v74_v52 = vshll.u32 %v34_v38, 8 }
  0x8c   :  { %vm37_vm1 = vcmp.gt.s32.totalorder %v36_v15, 0 }
  0x8d   :  { %v38_v17 = vsel %vm37_vm1, %v36_v15, 0  ;;  %vm118_vm1 = vweird.f32 %v327_v11 }
  0x8e   :  { %v40_v18 = vand.u32 31, %v38_v17  ;;  %v39_v21 = vshrl.u32 %v38_v17, 5 }
  0x90   :  { %v41_v20 = vsub.s32 32, %v40_v18  ;;  %v43_v23 = vshll.u32 %v302_v22, %v40_v18  ;;  %v46_v25 = vshll.u32 %v303_v24, %v40_v18  ;;  %v49_v29 = vshll.u32 %v304_v27, %v40_v18 }
  0x91   :  { %v52_v32 = vshll.u32 %v305_v30, %v40_v18  ;;  %v55_v35 = vshll.u32 %v306_v33, %v40_v18  ;;  %vm58_vm2 = vcmp.lt.s32.totalorder %v39_v21, 1  ;;  %vm61_vm3 = vcmp.lt.s32.totalorder %v39_v21, 4 }
  0x92   :  { %v44_v26 = vshrl.u32 %v303_v24, %v41_v20  ;;  %v47_v28 = vshrl.u32 %v304_v27, %v41_v20  ;;  %v50_v31 = vshrl.u32 %v305_v30, %v41_v20  ;;  %v53_v34 = vshrl.u32 %v306_v33, %v41_v20 }
  0x93   :  { %v56_v37 = vshrl.u32 %v307_v36, %v41_v20  ;;  %v42_v47 = vshrl.u32 %v302_v22, %v41_v20  ;;  %vm60_vm4 = vcmp.lt.s32.totalorder %v39_v21, 3  ;;  %vm59_vm5 = vcmp.lt.s32.totalorder %v39_v21, 2 }
  0x94   :  { %v45_v39 = vor.u32 %v44_v26, %v43_v23  ;;  %v48_v40 = vor.u32 %v47_v28, %v46_v25  ;;  %v51_v41 = vor.u32 %v50_v31, %v49_v29  ;;  %v54_v42 = vor.u32 %v53_v34, %v52_v32 }
  0x95   :  { %v57_v43 = vor.u32 %v56_v37, %v55_v35 }
  0x96   :  { %v63_v44 = vsel %vm61_vm3, %v51_v41, 2102212464  ;;  %v66_v45 = vsel %vm58_vm2, %v45_v39, %v48_v40  ;;  %v70_v46 = vsel %vm58_vm2, %v48_v40, %v51_v41  ;;  %v67_v48 = vsel %vm61_vm3, %v54_v42, 920167782 }
  0x97   :  { %v71_v49 = vsel %vm61_vm3, %v57_v43, 1326507024  ;;  %v68_v50 = vsel %vm60_vm4, %v51_v41, %v67_v48  ;;  %v62_v53 = vsel %vm58_vm2, %v42_v47, %v45_v39  ;;  %v64_v54 = vsel %vm60_vm4, %v48_v40, %v63_v44 }
  0x98   :  { %v72_v51 = vsel %vm60_vm4, %v54_v42, %v71_v49  ;;  %v69_v55 = vsel %vm59_vm5, %v66_v45, %v68_v50  ;;  %v65_v61 = vsel %vm59_vm5, %v62_v53, %v64_v54 }
  0x99   :  { %v73_v56 = vsel %vm59_vm5, %v70_v46, %v72_v51  ;;  %v336_v59 = vmul.u32.u64.low %v74_v52, %v69_v55  ;;  %v337_v60 = vmul.u32.u64.high %v74_v52, %v69_v55, %v336_v59  ;;  %v81_v63 = vmul.u32 %v74_v52, %v65_v61 }
  0x9a   :  { %v333_v57 = vmul.u32.u64.low %v74_v52, %v73_v56  ;;  %v334_v58 = vmul.u32.u64.high %v74_v52, %v73_v56, %v333_v57 }
  0x9b   :  { %v84_v62 = vadd.s32 1, %v337_v60 }
  0x9c   :  { %vm83_vm6 = vc.u32 %v334_v58, %v336_v59  ;;  %v82_v13 = vadd.s32 %v336_v59, %v334_v58 }
  0x9d   :  { %v85_v0 = vsel %vm83_vm6, %v84_v62, %v337_v60 }
  0x9e   :  { %v86_v1 = vadd.s32 %v85_v0, %v81_v63 }
  0xa0   :  { %v87_v2 = vadd.s32 536870912, %v86_v1 }
  0xa2   :  { %v88_v4 = vshrl.u32 %v87_v2, 30 }
  0xa4   :  { %v89_v5 = vshll.u32 %v88_v4, 30  ;;  %v112_v26 = vsub.s32 4, %v88_v4 }
  0xa6   :  { %v90_v6 = vsub.s32 %v86_v1, %v89_v5  ;;  %v113_v29 = vsel %vm28_vm8, %v112_v26, %v88_v4 }
  0xa7   :  { %v115_v31 = vsel %vm27_vm9, 0, %v113_v29 }
  0xa8   :  { %v92_v7 = vsub.s32 0, %v90_v6  ;;  %v119_v32 = vadd.s32 3, %v115_v31  ;;  %v223_v34 = vand.u32 3, %v115_v31 }
  0xaa   :  { %v251_v8 = vmin.u32 %v92_v7, %v90_v6  ;;  %v120_v33 = vand.u32 3, %v119_v32  ;;  %vm228_vm12 = vcmp.eq.s32.totalorder %v223_v34, 2  ;;  %vm225_vm14 = vcmp.eq.s32.totalorder %v223_v34, 0 }
  0xab   :  { %vm224_vm0 = vcmp.lt.s32.totalorder %v223_v34, 2 }
  0xac   :  { %v94_v9 = vclz %v251_v8  ;;  %vm125_vm11 = vcmp.eq.s32.totalorder %v120_v33, 2  ;;  %vm122_vm13 = vcmp.eq.s32.totalorder %v120_v33, 0  ;;  %vm121_vm15 = vcmp.lt.s32.totalorder %v120_v33, 2 }
  0xae   :  { %v252_v10 = vadd.s32 4294967294, %v94_v9 }
  0xb0   :  { %vm253_vm7 = vcmp.lt.s32.totalorder %v252_v10, 0 }
  0xb1   :  { %v97_v12 = vsel %vm253_vm7, 0, %v252_v10 }
  0xb2   :  { %v98_v14 = vsub.s32 32, %v97_v12  ;;  %v102_v15 = vsub.s32 4294967266, %v97_v12  ;;  %v99_v17 = vshll.u32 %v90_v6, %v97_v12 }
  0xb4   :  { %v100_v18 = vshrl.u32 %v82_v13, %v98_v14  ;;  %v103_v19 = vadd.s32 127, %v102_v15 }
  0xb6   :  { %v101_v20 = vor.u32 %v100_v18, %v99_v17  ;;  %v104_v21 = vshll.u32 %v103_v19, 23 }
  0xb8   :  { %v105_v22 = vor.u32 4788187, %v104_v21  ;;  %v108_v24 = vcvt.s32.f32 %v101_v20 }
  0xba   :  { %v106_v23 = vand.u32 2147483647, %v105_v22 }
  0xbc   :  { %v109_v25 = vmul.f32 %v108_v24, %v106_v23 }
  0xbe   :  { %v110_v27 = vxor.u32 2147483648, %v109_v25 }
  0xc0   :  { %v111_v28 = vsel %vm28_vm8, %v110_v27, %v109_v25 }
  0xc1   :  { %v114_v30 = vsel %vm27_vm9, %v327_v11, %v111_v28 }
  0xc2   :  { %273 = vcosq.f32 %v114_v30 }
  0xc3   :  { %275 = vsinq.f32 %v114_v30 }
  0xcc   :  { %v274_v35 = vpop.eup %273 }
  0xcd   :  { %v276_v36 = vpop.eup %275  ;;  %v126_v37 = vxor.u32 2147483648, %v274_v35 }
  0xce   :  { %v123_v38 = vxor.u32 2147483648, %v276_v36 }
  0xcf   :  { %v127_v16 = vsel %vm125_vm11, %v126_v37, %v276_v36  ;;  %v230_v39 = vsel %vm228_vm12, %v126_v37, %v276_v36 }
  0xd0   :  { %v124_v40 = vsel %vm122_vm13, %v274_v35, %v123_v38  ;;  %v227_v41 = vsel %vm225_vm14, %v274_v35, %v123_v38 }
  0xd1   :  { %v128_v42 = vsel %vm121_vm15, %v124_v40, %v127_v16  ;;  %v231_v43 = vsel %vm224_vm0, %v227_v41, %v230_v39 }
  0xd2   :  { %v129_v44 = vsel %vm118_vm1, nan, %v128_v42  ;;  %v232_v45 = vsel %vm118_vm1, nan, %v231_v43 }
  0xd3   :  { %v233_v46 = vsel %vm25_vm10, %v129_v44, %v232_v45 }
  0xd4   :  { %234 = vst [vmem:[#allocation2] sm:$0xff] %v233_v46 }
  0xd5   :  { %288 = shalt.err (!%p285_p4)
}
  0xd6   :  { %s289_s12 = scalar_lea.hbm %s364_s1, 128 }
  0xd7   :  { %p290_p5 = scmp.ne.s32.totalorder %s364_s1, %s289_s12  ;;  %p293_p6 = scmp.lt.u32.totalorder %s289_s12, %s364_s1 }
  0xd9   :  { %p295_p7 = pnand %p293_p6, %p290_p5 }
  0xdb   :  { %298 = shalt.err (!%p295_p7)
}
  0xdc   :  { %244 = dma.vmem_to_hbm [thread:$0]  %s242_s8, 128, %s364_s1, [#allocation3]  }
  0xdd   :  { %299 = dma.done.wait [#allocation3], 128  }
  0xde   :  { %300 = vsyncadd [#allocation3], 4294967168 }
  0xdf   :  { %248 = vsyncpa [#allocation3], 1 }

</bundles_post_ra>
